<compile_context>
chip_gen: v6e
topology: v6e:2x2x1
jax: 0.10.0
libtpu: 0.0.40
codegen_flags: <defaults>
</compile_context>

<pallas_src>
import jax
import jax.numpy as jnp
from jax.experimental import pallas as pl
from jax.experimental.pallas import tpu as pltpu

_EPS = 1e-12  # matches torch.nn.functional.normalize default eps


def _l2_caf_kernel(f_ref, a_ref, o_ref):
    # f_ref: (1, LB) pre-normalized filter slab (same block every row step).
    # a_ref / o_ref: (TB, LB) lane-dense activation tile.
    o_ref[...] = (a_ref[...] * f_ref[...]).astype(o_ref.dtype)


def _round_up(x, m):
    return ((x + m - 1) // m) * m


def _vmem_capacity_bytes():
    """Trace-time query of per-core VMEM; conservative fallback if unavailable."""
    try:
        cap = getattr(pltpu.get_tpu_info(), "vmem_capacity_bytes", None)
        if cap:
            return int(cap)
    except Exception:
        pass
    return 64 << 20  # conservative: v7x per-TensorCore VMEM


def _plan_tiles(rows, hw, itemsize):
    """Pick (row_block, lane_block, n_row_blocks, n_lane_blocks, vmem_limit).

    Budget: 2x double-buffered (in + out) tiles + filter must fit under
    vmem_limit_bytes, so tile_target <= (vmem_limit - 1 MiB) / 4, capped at
    8 MiB.  Lane blocks are multiples of 128 (or the full HW extent); row
    blocks are multiples of 8 (or the full row extent) and balanced via cdiv.
    """
    vmem_cap = _vmem_capacity_bytes()
    vmem_limit = min(vmem_cap // 2, 48 << 20)
    tile_target = min(8 << 20, max(1 << 20, (vmem_limit - (1 << 20)) // 4))

    # ---- lane (H*W) axis ----
    row_bytes = hw * itemsize
    if hw % 128 != 0 or row_bytes <= (512 << 10):
        lb = hw
        n_lane = 1
    else:
        # Keep at least 8 rows per tile: lane block <= tile_target / 8 bytes.
        max_lb = max(128, ((tile_target // (8 * itemsize)) // 128) * 128)
        n_lane = pl.cdiv(hw, max_lb)
        lb = _round_up(pl.cdiv(hw, n_lane), 128)   # balanced, multiple of 128
        n_lane = pl.cdiv(hw, lb)

    # ---- row (N*C) axis ----
    lb_bytes = lb * itemsize
    tb_target = max(8, ((tile_target // max(lb_bytes, 1)) // 8) * 8)
    if tb_target >= rows:
        if rows >= 16 and n_lane == 1:
            # Never collapse to a single grid step on megacore parts: split the
            # row axis so both TensorCores each stream half the rows.
            tb = _round_up(pl.cdiv(rows, 2), 8)
        else:
            tb = rows
    else:
        n_row = pl.cdiv(rows, tb_target)
        tb = min(rows, _round_up(pl.cdiv(rows, n_row), 8))  # balanced blocks
    n_row = pl.cdiv(rows, tb)

    return tb, lb, n_row, n_lane, vmem_limit


def l2_caf_forward(A, filt):
    """A: (N, C, H, W), filt: (H, W) float32 -> A * F.normalize(filt, dim=[0,1])."""
    N, C, H, W = A.shape
    assert filt.shape == (H, W)
    HW = H * W
    rows = N * C
    itemsize = jnp.dtype(A.dtype).itemsize

    # Hoist the normalization out of the kernel: computed exactly once.
    # scale = 1 / max(||f||_F, eps) via sqrt + divide (bit-close to PyTorch's
    # clamp_min path; avoids lax.rsqrt ULP differences).
    filt32 = filt.astype(jnp.float32)
    scale = 1.0 / jnp.maximum(jnp.sqrt(jnp.sum(filt32 * filt32)), _EPS)
    f_norm = (filt32 * scale).astype(A.dtype).reshape(1, HW)

    a_flat = A.reshape(rows, HW)  # lane-dense view: last dim = H*W
    tb, lb, n_row, n_lane, vmem_limit = _plan_tiles(rows, HW, itemsize)

    cost = pl.CostEstimate(
        flops=rows * HW,
        transcendentals=0,
        bytes_accessed=2 * rows * HW * itemsize + HW * itemsize,
    )

    out_flat = pl.pallas_call(
        _l2_caf_kernel,
        out_shape=jax.ShapeDtypeStruct((rows, HW), A.dtype),
        grid_spec=pltpu.PrefetchScalarGridSpec(
            num_scalar_prefetch=0,
            grid=(n_row, n_lane),
            in_specs=[
                # normalized filter: (1, lb) slab, re-used across row steps
                pl.BlockSpec((1, lb), lambda i, j: (0, j)),
                # activations: one lane-dense (tb, lb) slab per grid step
                pl.BlockSpec((tb, lb), lambda i, j: (i, j)),
            ],
            out_specs=pl.BlockSpec((tb, lb), lambda i, j: (i, j)),
        ),
        compiler_params=pltpu.CompilerParams(
            dimension_semantics=("parallel", "parallel"),
            vmem_limit_bytes=vmem_limit,
        ),
        cost_estimate=cost,
    )(f_norm, a_flat)

    return out_flat.reshape(N, C, H, W)


def _reference(A, filt):
    denom = jnp.maximum(jnp.sqrt(jnp.sum(filt * filt)), _EPS)
    return A * (filt / denom)


if __name__ == "__main__":
    key = jax.random.PRNGKey(0)

    # Test 1: module-scale shape (batch=2, channels=4, spatial=16).
    N, C, S = 2, 4, 16
    k1, k2 = jax.random.split(key)
    A = jax.random.normal(k1, (N, C, S, S), dtype=jnp.float32)
    filt = jnp.ones((S, S), dtype=jnp.float32)  # PyTorch init: ones((S, S))
    out = jax.block_until_ready(l2_caf_forward(A, filt))
    assert jnp.allclose(out, _reference(A, filt), rtol=1e-6, atol=1e-6), \
        "mismatch vs reference (test 1)"

    # Test 2: larger row count exercising the multi-row-block (megacore) path.
    N2, C2 = 4, 8
    A2 = jax.random.normal(k2, (N2, C2, S, S), dtype=jnp.float32)
    filt2 = jax.random.normal(jax.random.PRNGKey(1), (S, S), dtype=jnp.float32)
    out2 = jax.block_until_ready(l2_caf_forward(A2, filt2))
    assert jnp.allclose(out2, _reference(A2, filt2), rtol=1e-6, atol=1e-6), \
        "mismatch vs reference (test 2)"

    print("KERNEL_OK")
</pallas_src>

<mosaic_0001>
module attributes {stable_mosaic.version = 11 : i64} {
  func.func @_l2_caf_kernel(%arg0: i32, %arg1: i32, %arg2: memref<1x256xf32, #tpu.memory_space<vmem>>, %arg3: memref<8x256xf32, #tpu.memory_space<vmem>>, %arg4: memref<8x256xf32, #tpu.memory_space<vmem>>) attributes {dimension_semantics = [#tpu.dimension_semantics<parallel>, #tpu.dimension_semantics<parallel>], iteration_bounds = array<i64: 1, 1>, scalar_prefetch = 0 : i64, scratch_operands = 0 : i64, tpu.core_type = #tpu.core_type<tc>, window_params = [{transform_indices = @transform_0, window_bounds = array<i64: 1, 256>}, {transform_indices = @transform_1, window_bounds = array<i64: 8, 256>}, {transform_indices = @transform_2, window_bounds = array<i64: 8, 256>}]} {
    %c0 = arith.constant 0 : index
    %c0_0 = arith.constant 0 : index
    %0 = vector.load %arg3[%c0, %c0_0] : memref<8x256xf32, #tpu.memory_space<vmem>>, vector<8x256xf32>
    %c0_1 = arith.constant 0 : index
    %c0_2 = arith.constant 0 : index
    %1 = vector.load %arg2[%c0_1, %c0_2] : memref<1x256xf32, #tpu.memory_space<vmem>>, vector<1x256xf32>
    %2 = vector.broadcast %1 : vector<1x256xf32> to vector<8x256xf32>
    %3 = arith.mulf %0, %2 : vector<8x256xf32>
    %c0_3 = arith.constant 0 : index
    %c0_4 = arith.constant 0 : index
    %4 = vector.load %arg4[%c0_3, %c0_4] : memref<8x256xf32, #tpu.memory_space<vmem>>, vector<8x256xf32>
    tpu.vector_store %arg4[%c0_3, %c0_4], %3 {strides = array<i32>} : memref<8x256xf32, #tpu.memory_space<vmem>>, vector<8x256xf32>,
    return
  }
  func.func @transform_0(%arg0: i32, %arg1: i32) -> (i32, i32) {
    %c0_i32 = arith.constant 0 : i32
    %c0_i32_0 = arith.constant 0 : i32
    return %c0_i32, %arg1 : i32, i32
  }
  func.func @transform_1(%arg0: i32, %arg1: i32) -> (i32, i32) {
    %c0_i32 = arith.constant 0 : i32
    return %arg0, %arg1 : i32, i32
  }
  func.func @transform_2(%arg0: i32, %arg1: i32) -> (i32, i32) {
    %c0_i32 = arith.constant 0 : i32
    return %arg0, %arg1 : i32, i32
  }
}

</mosaic_0001>

<bundles_post_ra>
// kernel: tpu_custom_call.1
= control target key start
LH: loop header
LB: loop body
LE: loop exit
PB: predicated region body
PF: predicated region fallthrough
CT: control target
= control target key end

     0   :  { %7 = vsyncpa [#allocation3], 0  ;;  %s166_s0 = inlined_call_operand.hbm [shape: f32[1,256], index: 0, kind: input, shape index: {}]   ;;  %s167_s1 = inlined_call_operand.hbm [shape: f32[8,256], index: 1, kind: input, shape index: {}]   ;;  %s168_s2 = inlined_call_operand.hbm [shape: f32[8,256], index: 2, kind: output, shape index: {}]  }
   0x1   :  { %8 = vsyncpa [#allocation6], 0 }
   0x2   :  { %9 = vsyncpa [#allocation4], 0  ;;  %s139_s9 = smov [#allocation2]   ;;  %s140_s11 = smov [#allocation5]  }
   0x3   :  { %s16_s10 = sshll.u32 %s139_s9, 4  ;;  %s26_s12 = sshll.u32 %s140_s11, 4  ;;  %s17_s10 = int_to_ptr.vmem [resolvable:$true] %s16_s10  ;;  %s27_s12 = int_to_ptr.vmem [resolvable:$true] %s26_s12 }
   0x4   :  { %s81_s13 = scalar_lea.vmem %s17_s10, 32  ;;  %p86_p1 = scmp.lt.s32.totalorder %s17_s10, %s17_s10 }
   0x5   :  { %p82_p0 = scmp.ne.s32.totalorder %s17_s10, %s81_s13  ;;  %p87_p2 = scmp.lt.s32.totalorder %s81_s13, %s81_s13 }
   0x7   :  { %p88_p3 = por %p87_p2, %p86_p1 }
   0x9   :  { %p89_p4 = pnand %p88_p3, %p82_p0 }
   0xb   :  { %92 = shalt.err (!%p89_p4)
}
   0xc   :  { %19 = dma.hbm_to_vmem [thread:$0]  %s166_s0, 32, %s17_s10, [#allocation3]  }
   0xd   :  { %s101_s16 = scalar_lea.vmem %s27_s12, 256  ;;  %p106_p6 = scmp.lt.s32.totalorder %s27_s12, %s27_s12 }
   0xe   :  { %p102_p5 = scmp.ne.s32.totalorder %s27_s12, %s101_s16  ;;  %p107_p7 = scmp.lt.s32.totalorder %s101_s16, %s101_s16 }
  0x10   :  { %p108_p8 = por %p107_p7, %p106_p6 }
  0x12   :  { %p109_p9 = pnand %p108_p8, %p102_p5 }
  0x14   :  { %112 = shalt.err (!%p109_p9)
}
  0x15   :  { %29 = dma.hbm_to_vmem [thread:$0]  %s167_s1, 256, %s27_s12, [#allocation6]  }
  0x16   :  { %133 = dma.done.wait [#allocation3], 32  }
  0x17   :  { %134 = vsyncadd [#allocation3], 4294967264 }
  0x18   :  { %135 = dma.done.wait [#allocation6], 256  }
  0x19   :  { %136 = vsyncadd [#allocation6], 4294967040  ;;  %v40_v0 = vlaneseq  ;;  %v36_v4 = vld [vmem:[#allocation5] sm:$0xff]  ;;  %v38_v5 = vld [vmem:[#allocation2] sm:$0x3]  ;;  %s141_s0 = smov [#allocation7]  }
  0x1a   :  { %v37_v6 = vld [vmem:[#allocation5 + $0x8] sm:$0xff]  ;;  %s60_s19 = sshll.u32 %s141_s0, 4  ;;  %s61_s19 = int_to_ptr.vmem [resolvable:$true] %s60_s19 }
  0x1b   :  { %v41_v1 = vshrl.u32 %v40_v0, 7  ;;  %s113_s1 = scalar_lea.vmem %s61_s19, 256  ;;  %p118_p11 = scmp.lt.s32.totalorder %s61_s19, %s61_s19 }
  0x1c   :  { %p114_p10 = scmp.ne.s32.totalorder %s61_s19, %s113_s1  ;;  %p119_p12 = scmp.lt.s32.totalorder %s113_s1, %s113_s1 }
  0x1d   :  { %v42_v2 = vsub.s32 0, %v41_v1  ;;  %v46_v3 = vsub.s32 1, %v41_v1 }
  0x1e   :  { %p120_p13 = por %p119_p12, %p118_p11 }
  0x1f   :  { %v43_v7 = vrot.slane %v38_v5, %v42_v2  ;;  %v47_v8 = vrot.slane %v38_v5, %v46_v3 }
  0x20   :  { %p121_p0 = pnand %p120_p13, %p114_p10 }
  0x21   :  { %v50_v9 = vmul.f32 %v43_v7, %v36_v4  ;;  %v51_v10 = vmul.f32 %v47_v8, %v37_v6 }
  0x23   :  { %52 = vst [vmem:[#allocation7] sm:$0xff] %v50_v9  ;;  %53 = vst [vmem:[#allocation7 + $0x8] sm:$0xff] %v51_v10 }
  0x24   :  { %124 = shalt.err (!%p121_p0)
}
  0x25   :  { %63 = dma.vmem_to_hbm [thread:$0]  %s61_s19, 256, %s168_s2, [#allocation4]  }
  0x26   :  { %137 = dma.done.wait [#allocation4], 256  }
  0x27   :  { %138 = vsyncadd [#allocation4], 4294967040 }
  0x28   :  { %67 = vsyncpa [#allocation3], 1 }
  0x29   :  { %68 = vsyncpa [#allocation6], 1 }
  0x2a   :  { %69 = vsyncpa [#allocation4], 1 }

</bundles_post_ra>
